<compile_context>
chip_gen: v7x
topology: tpu7x:2x2x1
jax: 0.10.0
libtpu: 0.0.40
codegen_flags: <defaults>
</compile_context>

<pallas_src>
import jax
import jax.numpy as jnp
from jax import lax
from jax.experimental import pallas as pl
from jax.experimental.pallas import tpu as pltpu


# ----------------------------------------------------------------------------
# Pallas kernel
# ----------------------------------------------------------------------------
def _make_kernel(K, dilation, P, n, F):
    """Static-shape kernel.  n = n_inputs = n_outputs, C = 2n.

    Per grid step the kernel sees one (C, F + P) slab: `batch_block` batch
    elements along the lane axis, each as a [P zeros][T data] segment of
    length Tseg = T + P, plus P extra zero lanes at the very front so the K
    dilated causal taps are plain static lane slices of length F.
    """
    C = 2 * n
    d = dilation

    def kernel(x_ref, mask_ref, w1_ref, b1_ref, w2_ref, b2_ref, out_ref, hbuf):
        mask = mask_ref[...]                          # (1, F): 0 on per-segment pad lanes

        def causal_conv(src, w_ref, b_ref):
            # Dilated causal conv pair (hidden + gate) with fused block-diagonal
            # per-tap weights: K accumulated (C, C) x (C, F) MXU matmuls over
            # static lane slices -- no im2col buffer, no per-batch broadcast.
            acc = None
            for k in range(K):                        # K is small and static
                tap = src[:, k * d: k * d + F]        # (C, F) static lane slice
                part = jnp.dot(w_ref[k], tap,
                               preferred_element_type=jnp.float32)
                acc = part if acc is None else acc + part
            return acc + b_ref[...]                   # (C, 1) bias, lane broadcast

        # ---------------- stage 1 ----------------
        z1 = causal_conv(x_ref, w1_ref, b1_ref)
        if P > 0:
            z1 = z1 * mask        # zero the causal-pad lanes that feed stage 2
        g1 = z1[n:, :]                                # raw (pre-sigmoid) gate
        h1 = z1[:n, :] * jax.nn.sigmoid(g1)           # gated hidden
        # torch.cat((hidden, gate), dim=1) + chomp + causal re-pad, with no
        # concatenate: write both halves straight into the padded VMEM scratch.
        if P > 0:
            hbuf[:, :P] = jnp.zeros((C, P), jnp.float32)   # causal left pad
        hbuf[:n, P:] = h1
        hbuf[n:, P:] = g1

        # ---------------- stage 2 (taps read straight from the scratch) ------
        z2 = causal_conv(hbuf, w2_ref, b2_ref)
        g2 = z2[n:, :]
        h2 = z2[:n, :] * jax.nn.sigmoid(g2)

        # residual: downsample is None in every runnable config (n_in == n_out)
        res = x_ref[:, P:]                            # (C, F) original input lanes
        out_ref[:n, :] = (h2 + res[:n, :]).astype(out_ref.dtype)
        out_ref[n:, :] = (g2 + res[n:, :]).astype(out_ref.dtype)
        # TODO(synk): dropout1 / dropout2 are identity (inference / eval mode).

    return kernel


# ----------------------------------------------------------------------------
# Weight fusion helpers (wrapper-side glue)
# ----------------------------------------------------------------------------
def _fuse_sep_weights(Wh, Wg):
    """PyTorch (n, n, K) hidden & gate conv weights -> per-tap block-diagonal
    fused weights (K, 2n, 2n): rows/cols [0:n] = hidden path, [n:2n] = gate."""
    n_out, n_in, K = Wh.shape
    C = n_out + Wg.shape[0]
    w = jnp.zeros((K, C, C), jnp.float32)
    w = w.at[:, :n_out, :n_in].set(jnp.moveaxis(Wh, 2, 0).astype(jnp.float32))
    w = w.at[:, n_out:, n_in:].set(jnp.moveaxis(Wg, 2, 0).astype(jnp.float32))
    return w


# ----------------------------------------------------------------------------
# Wrapper
# ----------------------------------------------------------------------------
def gated_temporal_block_sep(x, params, *, kernel_size, dilation, padding,
                             stride=1, batch_block=None,
                             vmem_budget_bytes=8 << 20):
    """x: (B, 2*n_inputs, T) float32, PyTorch NCT layout.
    Returns (B, 2*n_outputs, T) NCT (matches the module forward, eval mode)."""
    assert stride == 1, "TCN block implemented for stride=1"
    assert padding == (kernel_size - 1) * dilation, "causal TCN padding expected"

    W1, b1 = params["w1"], params["b1"]
    Wg1, bg1 = params["wg1"], params["bg1"]
    W2, b2 = params["w2"], params["b2"]
    Wg2, bg2 = params["wg2"], params["bg2"]

    B, C, T = x.shape
    n_out, n_in, K = W1.shape
    assert C == 2 * n_in, "input must have 2*n_inputs channels (x.chunk(2, dim=1))"
    # TODO(synk): for n_inputs != n_outputs the reference forward applies
    # Conv1d(n_inputs, n_outputs, 1) to a 2*n_inputs-channel tensor and cannot
    # execute; only the runnable n_inputs == n_outputs (downsample=None) config
    # is implemented.
    assert n_in == n_out, "only the runnable n_inputs == n_outputs config is supported"
    n = n_out
    P = padding
    Tseg = T + P                      # per-batch lane segment: [P zeros][T data]

    # Fused per-tap block-diagonal weights (K, C, C) and stacked biases (C, 1).
    w1f = _fuse_sep_weights(W1, Wg1)
    w2f = _fuse_sep_weights(W2, Wg2)
    b1f = jnp.concatenate([b1, bg1]).reshape(C, 1).astype(jnp.float32)
    b2f = jnp.concatenate([b2, bg2]).reshape(C, 1).astype(jnp.float32)

    x = x.astype(jnp.float32)

    # ---- batch_block from a VMEM budget ------------------------------------
    # Live f32 per step ~= 2x in + 2x out (double-buffered) + scratch + a few
    # (C, F) intermediates ~= 10 * C * F * 4 bytes, F = batch_block * Tseg.
    if batch_block is None:
        per_batch = 10 * C * Tseg * 4
        batch_block = max(1, vmem_budget_bytes // per_batch)
        if B >= 2:
            # keep >= 2 grid steps so v7x's two TensorCores both get work;
            # on v5e (single core) callers may pass batch_block=B instead.
            batch_block = min(batch_block, pl.cdiv(B, 2))
    batch_block = int(max(1, min(batch_block, B)))
    n_blocks = pl.cdiv(B, batch_block)
    B_pad = n_blocks * batch_block

    F = batch_block * Tseg            # lane extent of one kernel slab
    FP = F + P                        # + P extra front zeros for the dilated taps

    # Layout glue (wrapper-side XLA, one transpose): (B, C, T)
    #   -> causal left pad         (B_pad, C, Tseg)
    #   -> fold batch into lanes   (n_blocks, C, batch_block * Tseg)
    #   -> extra P front zeros     (n_blocks, C, FP)
    xp = jnp.pad(x, ((0, B_pad - B), (0, 0), (P, 0)))
    xp = xp.reshape(n_blocks, batch_block, C, Tseg)
    xp = xp.transpose(0, 2, 1, 3).reshape(n_blocks, C, F)
    xe = jnp.pad(xp, ((0, 0), (0, 0), (P, 0)))

    # Per-segment causal-pad lane mask for the stage-1 -> stage-2 handoff.
    mask = ((jnp.arange(F) % Tseg) >= P).astype(jnp.float32).reshape(1, F)

    kernel = _make_kernel(K, dilation, P, n, F)

    out = pl.pallas_call(
        kernel,
        out_shape=jax.ShapeDtypeStruct((n_blocks, C, F), jnp.float32),
        grid=(n_blocks,),
        in_specs=[
            pl.BlockSpec((None, C, FP), lambda i: (i, 0, 0)),   # input slab
            pl.BlockSpec((1, F), lambda i: (0, 0)),             # pad mask
            pl.BlockSpec((K, C, C), lambda i: (0, 0, 0)),        # fused W1
            pl.BlockSpec((C, 1), lambda i: (0, 0)),              # fused b1
            pl.BlockSpec((K, C, C), lambda i: (0, 0, 0)),        # fused W2
            pl.BlockSpec((C, 1), lambda i: (0, 0)),              # fused b2
        ],
        out_specs=pl.BlockSpec((None, C, F), lambda i: (i, 0, 0)),
        scratch_shapes=[pltpu.VMEM((C, FP), jnp.float32)],       # stage-2 input
        compiler_params=pltpu.CompilerParams(
            dimension_semantics=("parallel",),
            vmem_limit_bytes=32 << 20),
    )(xe, mask, w1f, b1f, w2f, b2f)

    # (n_blocks, C, F) -> (B, C, T): undo the lane folding, drop the pads.
    out = out.reshape(n_blocks, C, batch_block, Tseg).transpose(0, 2, 1, 3)
    out = out.reshape(B_pad, C, Tseg)[:B, :, P:]
    return out


# ----------------------------------------------------------------------------
# Pure-JAX reference (mirrors the PyTorch forward, eval mode)
# ----------------------------------------------------------------------------
def ref_forward(x, params, *, kernel_size, dilation, padding):
    def conv(inp, W, b, dil, pad):
        y = lax.conv_general_dilated(
            inp, W, window_strides=(1,), padding=[(pad, pad)],
            rhs_dilation=(dil,), dimension_numbers=("NCH", "OIH", "NCH"))
        return y + b[None, :, None]

    xh, xg = jnp.split(x, 2, axis=1)
    hidden = conv(xh, params["w1"], params["b1"], dilation, padding)
    gate = conv(xg, params["wg1"], params["bg1"], dilation, padding)
    hidden = hidden * jax.nn.sigmoid(gate)
    hidden = jnp.concatenate([hidden, gate], axis=1)[:, :, :-padding]
    hh, hg = jnp.split(hidden, 2, axis=1)
    gate = conv(hg, params["wg2"], params["bg2"], dilation, padding)
    hidden = conv(hh, params["w2"], params["b2"], dilation, padding)
    hidden = hidden * jax.nn.sigmoid(gate)
    hidden = jnp.concatenate([hidden, gate], axis=1)[:, :, :-padding]
    return hidden + x  # downsample is None (n_inputs == n_outputs)


# ----------------------------------------------------------------------------
# Deterministic parameter construction (weight_norm reparam applied explicitly)
# ----------------------------------------------------------------------------
def weight_norm_weight(key, shape, std):
    kv, kg = jax.random.split(key)
    v = std * jax.random.normal(kv, shape, jnp.float32)
    g = 1.0 + 0.1 * jax.random.normal(kg, (shape[0],), jnp.float32)
    norm = jnp.sqrt(jnp.sum(v * v, axis=(1, 2), keepdims=True)) + 1e-12
    return g[:, None, None] * v / norm


if __name__ == "__main__":
    # module config: n_inputs = n_outputs = 8 (downsample is None), x has 16 ch.
    # T=28, P=4 -> Tseg=32 so the default batch_block=4 gives a 128-lane slab.
    B, n, T = 8, 8, 28
    K, stride, dilation = 3, 1, 2
    padding = (K - 1) * dilation

    key = jax.random.PRNGKey(0)
    ks = jax.random.split(key, 9)

    x = jax.random.normal(ks[0], (B, 2 * n, T), jnp.float32)

    params = dict(
        w1=weight_norm_weight(ks[1], (n, n, K), 0.01),
        b1=0.05 * jax.random.normal(ks[2], (n,), jnp.float32),
        wg1=weight_norm_weight(ks[3], (n, n, K), 0.01),
        bg1=0.05 * jax.random.normal(ks[4], (n,), jnp.float32),
        w2=weight_norm_weight(ks[5], (n, n, K), 0.01),
        b2=0.05 * jax.random.normal(ks[6], (n,), jnp.float32),
        wg2=weight_norm_weight(ks[7], (n, n, K), 0.01),
        bg2=0.05 * jax.random.normal(ks[8], (n,), jnp.float32),
    )

    out = gated_temporal_block_sep(
        x, params, kernel_size=K, dilation=dilation,
        padding=padding, stride=stride)
    out = jax.block_until_ready(out)

    ref = ref_forward(x, params, kernel_size=K, dilation=dilation,
                      padding=padding)

    assert out.shape == (B, 2 * n, T), out.shape
    assert jnp.allclose(out, ref, atol=1e-4, rtol=1e-4), \
        float(jnp.max(jnp.abs(out - ref)))
    print("KERNEL_OK")
</pallas_src>

<mosaic_0001>
module attributes {stable_mosaic.version = 11 : i64} {
  func.func @kernel(%arg0: i32, %arg1: memref<1x16x132xf32, #tpu.memory_space<vmem>>, %arg2: memref<1x128xf32, #tpu.memory_space<vmem>>, %arg3: memref<3x16x16xf32, #tpu.memory_space<vmem>>, %arg4: memref<16x1xf32, #tpu.memory_space<vmem>>, %arg5: memref<3x16x16xf32, #tpu.memory_space<vmem>>, %arg6: memref<16x1xf32, #tpu.memory_space<vmem>>, %arg7: memref<1x16x128xf32, #tpu.memory_space<vmem>>, %arg8: memref<16x132xf32, #tpu.memory_space<vmem>>) attributes {dimension_semantics = [#tpu.dimension_semantics<parallel>], iteration_bounds = array<i64: 2>, scalar_prefetch = 0 : i64, scratch_operands = 1 : i64, tpu.core_type = #tpu.core_type<tc>, window_params = [{transform_indices = @transform_0, window_bounds = array<i64: 1, 16, 132>}, {pipeline_mode = #tpu.pipeline_mode<synchronous>, transform_indices = @transform_1, window_bounds = array<i64: 1, 128>}, {pipeline_mode = #tpu.pipeline_mode<synchronous>, transform_indices = @transform_2, window_bounds = array<i64: 3, 16, 16>}, {pipeline_mode = #tpu.pipeline_mode<synchronous>, transform_indices = @transform_3, window_bounds = array<i64: 16, 1>}, {pipeline_mode = #tpu.pipeline_mode<synchronous>, transform_indices = @transform_4, window_bounds = array<i64: 3, 16, 16>}, {pipeline_mode = #tpu.pipeline_mode<synchronous>, transform_indices = @transform_5, window_bounds = array<i64: 16, 1>}, {transform_indices = @transform_6, window_bounds = array<i64: 1, 16, 128>}]} {
    %c0 = arith.constant 0 : index
    %c0_0 = arith.constant 0 : index
    %0 = vector.load %arg2[%c0, %c0_0] : memref<1x128xf32, #tpu.memory_space<vmem>>, vector<1x128xf32>
    %c0_1 = arith.constant 0 : index
    %c0_2 = arith.constant 0 : index
    %c0_3 = arith.constant 0 : index
    %1 = vector.load %arg1[%c0_1, %c0_2, %c0_3] : memref<1x16x132xf32, #tpu.memory_space<vmem>>, vector<1x16x128xf32>
    %2 = vector.shape_cast %1 : vector<1x16x128xf32> to vector<16x128xf32>
    %c0_4 = arith.constant 0 : index
    %c0_5 = arith.constant 0 : index
    %c0_6 = arith.constant 0 : index
    %3 = vector.load %arg3[%c0_4, %c0_5, %c0_6] : memref<3x16x16xf32, #tpu.memory_space<vmem>>, vector<1x16x16xf32>
    %4 = vector.shape_cast %3 : vector<1x16x16xf32> to vector<16x16xf32>
    %cst = arith.constant dense<0.000000e+00> : vector<16x128xf32>
    %5 = tpu.matmul %4, %2, %cst {dimension_numbers = #tpu.dot_dimension_numbers<[1], [0], [0], [1], [0, 0, 1, 1], [], []>} : vector<16x16xf32>, vector<16x128xf32>, vector<16x128xf32> -> vector<16x128xf32>
    %c0_7 = arith.constant 0 : index
    %c0_8 = arith.constant 0 : index
    %c2 = arith.constant 2 : index
    %6 = vector.load %arg1[%c0_7, %c0_8, %c2] : memref<1x16x132xf32, #tpu.memory_space<vmem>>, vector<1x16x128xf32>
    %7 = vector.shape_cast %6 : vector<1x16x128xf32> to vector<16x128xf32>
    %c1 = arith.constant 1 : index
    %c0_9 = arith.constant 0 : index
    %c0_10 = arith.constant 0 : index
    %8 = vector.load %arg3[%c1, %c0_9, %c0_10] : memref<3x16x16xf32, #tpu.memory_space<vmem>>, vector<1x16x16xf32>
    %9 = vector.shape_cast %8 : vector<1x16x16xf32> to vector<16x16xf32>
    %cst_11 = arith.constant dense<0.000000e+00> : vector<16x128xf32>
    %10 = tpu.matmul %9, %7, %cst_11 {dimension_numbers = #tpu.dot_dimension_numbers<[1], [0], [0], [1], [0, 0, 1, 1], [], []>} : vector<16x16xf32>, vector<16x128xf32>, vector<16x128xf32> -> vector<16x128xf32>
    %11 = arith.addf %5, %10 : vector<16x128xf32>
    %c0_12 = arith.constant 0 : index
    %c0_13 = arith.constant 0 : index
    %c4 = arith.constant 4 : index
    %12 = vector.load %arg1[%c0_12, %c0_13, %c4] : memref<1x16x132xf32, #tpu.memory_space<vmem>>, vector<1x16x128xf32>
    %13 = vector.shape_cast %12 : vector<1x16x128xf32> to vector<16x128xf32>
    %c2_14 = arith.constant 2 : index
    %c0_15 = arith.constant 0 : index
    %c0_16 = arith.constant 0 : index
    %14 = vector.load %arg3[%c2_14, %c0_15, %c0_16] : memref<3x16x16xf32, #tpu.memory_space<vmem>>, vector<1x16x16xf32>
    %15 = vector.shape_cast %14 : vector<1x16x16xf32> to vector<16x16xf32>
    %cst_17 = arith.constant dense<0.000000e+00> : vector<16x128xf32>
    %16 = tpu.matmul %15, %13, %cst_17 {dimension_numbers = #tpu.dot_dimension_numbers<[1], [0], [0], [1], [0, 0, 1, 1], [], []>} : vector<16x16xf32>, vector<16x128xf32>, vector<16x128xf32> -> vector<16x128xf32>
    %17 = arith.addf %11, %16 : vector<16x128xf32>
    %c0_18 = arith.constant 0 : index
    %c0_19 = arith.constant 0 : index
    %18 = vector.load %arg4[%c0_18, %c0_19] : memref<16x1xf32, #tpu.memory_space<vmem>>, vector<16x1xf32>
    %19 = vector.broadcast %18 : vector<16x1xf32> to vector<16x128xf32>
    %20 = arith.addf %17, %19 : vector<16x128xf32>
    %21 = vector.broadcast %0 : vector<1x128xf32> to vector<16x128xf32>
    %22 = arith.mulf %20, %21 : vector<16x128xf32>
    %23 = vector.extract_strided_slice %22 {offsets = [8, 0], sizes = [8, 128], strides = [1, 1]} : vector<16x128xf32> to vector<8x128xf32>
    %24 = vector.extract_strided_slice %22 {offsets = [0, 0], sizes = [8, 128], strides = [1, 1]} : vector<16x128xf32> to vector<8x128xf32>
    %25 = arith.negf %23 : vector<8x128xf32>
    %26 = math.exp %25 : vector<8x128xf32>
    %cst_20 = arith.constant 1.000000e+00 : f32
    %27 = vector.broadcast %cst_20 : f32 to vector<8x128xf32>
    %28 = arith.addf %27, %26 : vector<8x128xf32>
    %29 = arith.divf %27, %28 : vector<8x128xf32>
    %30 = arith.mulf %24, %29 : vector<8x128xf32>
    %cst_21 = arith.constant 0.000000e+00 : f32
    %31 = vector.broadcast %cst_21 : f32 to vector<16x4xf32>
    %c0_22 = arith.constant 0 : index
    %c0_23 = arith.constant 0 : index
    %32 = vector.load %arg8[%c0_22, %c0_23] : memref<16x132xf32, #tpu.memory_space<vmem>>, vector<16x4xf32>
    tpu.vector_store %arg8[%c0_22, %c0_23], %31 {strides = array<i32>} : memref<16x132xf32, #tpu.memory_space<vmem>>, vector<16x4xf32>,
    %c0_24 = arith.constant 0 : index
    %c4_25 = arith.constant 4 : index
    %33 = vector.load %arg8[%c0_24, %c4_25] : memref<16x132xf32, #tpu.memory_space<vmem>>, vector<8x128xf32>
    tpu.vector_store %arg8[%c0_24, %c4_25], %30 {strides = array<i32>} : memref<16x132xf32, #tpu.memory_space<vmem>>, vector<8x128xf32>,
    %c8 = arith.constant 8 : index
    %c4_26 = arith.constant 4 : index
    %34 = vector.load %arg8[%c8, %c4_26] : memref<16x132xf32, #tpu.memory_space<vmem>>, vector<8x128xf32>
    tpu.vector_store %arg8[%c8, %c4_26], %23 {strides = array<i32>} : memref<16x132xf32, #tpu.memory_space<vmem>>, vector<8x128xf32>,
    %c0_27 = arith.constant 0 : index
    %c0_28 = arith.constant 0 : index
    %35 = vector.load %arg8[%c0_27, %c0_28] : memref<16x132xf32, #tpu.memory_space<vmem>>, vector<16x128xf32>
    %c0_29 = arith.constant 0 : index
    %c0_30 = arith.constant 0 : index
    %c0_31 = arith.constant 0 : index
    %36 = vector.load %arg5[%c0_29, %c0_30, %c0_31] : memref<3x16x16xf32, #tpu.memory_space<vmem>>, vector<1x16x16xf32>
    %37 = vector.shape_cast %36 : vector<1x16x16xf32> to vector<16x16xf32>
    %cst_32 = arith.constant dense<0.000000e+00> : vector<16x128xf32>
    %38 = tpu.matmul %37, %35, %cst_32 {dimension_numbers = #tpu.dot_dimension_numbers<[1], [0], [0], [1], [0, 0, 1, 1], [], []>} : vector<16x16xf32>, vector<16x128xf32>, vector<16x128xf32> -> vector<16x128xf32>
    %c0_33 = arith.constant 0 : index
    %c2_34 = arith.constant 2 : index
    %39 = vector.load %arg8[%c0_33, %c2_34] : memref<16x132xf32, #tpu.memory_space<vmem>>, vector<16x128xf32>
    %c1_35 = arith.constant 1 : index
    %c0_36 = arith.constant 0 : index
    %c0_37 = arith.constant 0 : index
    %40 = vector.load %arg5[%c1_35, %c0_36, %c0_37] : memref<3x16x16xf32, #tpu.memory_space<vmem>>, vector<1x16x16xf32>
    %41 = vector.shape_cast %40 : vector<1x16x16xf32> to vector<16x16xf32>
    %cst_38 = arith.constant dense<0.000000e+00> : vector<16x128xf32>
    %42 = tpu.matmul %41, %39, %cst_38 {dimension_numbers = #tpu.dot_dimension_numbers<[1], [0], [0], [1], [0, 0, 1, 1], [], []>} : vector<16x16xf32>, vector<16x128xf32>, vector<16x128xf32> -> vector<16x128xf32>
    %43 = arith.addf %38, %42 : vector<16x128xf32>
    %c0_39 = arith.constant 0 : index
    %c4_40 = arith.constant 4 : index
    %44 = vector.load %arg8[%c0_39, %c4_40] : memref<16x132xf32, #tpu.memory_space<vmem>>, vector<16x128xf32>
    %c2_41 = arith.constant 2 : index
    %c0_42 = arith.constant 0 : index
    %c0_43 = arith.constant 0 : index
    %45 = vector.load %arg5[%c2_41, %c0_42, %c0_43] : memref<3x16x16xf32, #tpu.memory_space<vmem>>, vector<1x16x16xf32>
    %46 = vector.shape_cast %45 : vector<1x16x16xf32> to vector<16x16xf32>
    %cst_44 = arith.constant dense<0.000000e+00> : vector<16x128xf32>
    %47 = tpu.matmul %46, %44, %cst_44 {dimension_numbers = #tpu.dot_dimension_numbers<[1], [0], [0], [1], [0, 0, 1, 1], [], []>} : vector<16x16xf32>, vector<16x128xf32>, vector<16x128xf32> -> vector<16x128xf32>
    %48 = arith.addf %43, %47 : vector<16x128xf32>
    %c0_45 = arith.constant 0 : index
    %c0_46 = arith.constant 0 : index
    %49 = vector.load %arg6[%c0_45, %c0_46] : memref<16x1xf32, #tpu.memory_space<vmem>>, vector<16x1xf32>
    %50 = vector.broadcast %49 : vector<16x1xf32> to vector<16x128xf32>
    %51 = arith.addf %48, %50 : vector<16x128xf32>
    %52 = vector.extract_strided_slice %51 {offsets = [8, 0], sizes = [8, 128], strides = [1, 1]} : vector<16x128xf32> to vector<8x128xf32>
    %53 = vector.extract_strided_slice %51 {offsets = [0, 0], sizes = [8, 128], strides = [1, 1]} : vector<16x128xf32> to vector<8x128xf32>
    %54 = arith.negf %52 : vector<8x128xf32>
    %55 = math.exp %54 : vector<8x128xf32>
    %cst_47 = arith.constant 1.000000e+00 : f32
    %56 = vector.broadcast %cst_47 : f32 to vector<8x128xf32>
    %57 = arith.addf %56, %55 : vector<8x128xf32>
    %58 = arith.divf %56, %57 : vector<8x128xf32>
    %59 = arith.mulf %53, %58 : vector<8x128xf32>
    %c0_48 = arith.constant 0 : index
    %c0_49 = arith.constant 0 : index
    %c4_50 = arith.constant 4 : index
    %60 = vector.load %arg1[%c0_48, %c0_49, %c4_50] : memref<1x16x132xf32, #tpu.memory_space<vmem>>, vector<1x16x128xf32>
    %61 = vector.shape_cast %60 : vector<1x16x128xf32> to vector<16x128xf32>
    %62 = vector.extract_strided_slice %61 {offsets = [0, 0], sizes = [8, 128], strides = [1, 1]} : vector<16x128xf32> to vector<8x128xf32>
    %63 = arith.addf %59, %62 : vector<8x128xf32>
    %c0_51 = arith.constant 0 : index
    %c0_52 = arith.constant 0 : index
    %c0_53 = arith.constant 0 : index
    %64 = vector.load %arg7[%c0_51, %c0_52, %c0_53] : memref<1x16x128xf32, #tpu.memory_space<vmem>>, vector<1x8x128xf32>
    %65 = vector.shape_cast %64 : vector<1x8x128xf32> to vector<8x128xf32>
    %66 = vector.shape_cast %63 : vector<8x128xf32> to vector<1x8x128xf32>
    tpu.vector_store %arg7[%c0_51, %c0_52, %c0_53], %66 {strides = array<i32>} : memref<1x16x128xf32, #tpu.memory_space<vmem>>, vector<1x8x128xf32>,
    %67 = vector.extract_strided_slice %61 {offsets = [8, 0], sizes = [8, 128], strides = [1, 1]} : vector<16x128xf32> to vector<8x128xf32>
    %68 = arith.addf %52, %67 : vector<8x128xf32>
    %c0_54 = arith.constant 0 : index
    %c8_55 = arith.constant 8 : index
    %c0_56 = arith.constant 0 : index
    %69 = vector.load %arg7[%c0_54, %c8_55, %c0_56] : memref<1x16x128xf32, #tpu.memory_space<vmem>>, vector<1x8x128xf32>
    %70 = vector.shape_cast %69 : vector<1x8x128xf32> to vector<8x128xf32>
    %71 = vector.shape_cast %68 : vector<8x128xf32> to vector<1x8x128xf32>
    tpu.vector_store %arg7[%c0_54, %c8_55, %c0_56], %71 {strides = array<i32>} : memref<1x16x128xf32, #tpu.memory_space<vmem>>, vector<1x8x128xf32>,
    return
  }
  func.func @transform_0(%arg0: i32) -> (i32, i32, i32) {
    %c0_i32 = arith.constant 0 : i32
    %c0_i32_0 = arith.constant 0 : i32
    %c0_i32_1 = arith.constant 0 : i32
    return %arg0, %c0_i32, %c0_i32_0 : i32, i32, i32
  }
  func.func @transform_1(%arg0: i32) -> (i32, i32) {
    %c0_i32 = arith.constant 0 : i32
    %c0_i32_0 = arith.constant 0 : i32
    %c0_i32_1 = arith.constant 0 : i32
    return %c0_i32, %c0_i32_0 : i32, i32
  }
  func.func @transform_2(%arg0: i32) -> (i32, i32, i32) {
    %c0_i32 = arith.constant 0 : i32
    %c0_i32_0 = arith.constant 0 : i32
    %c0_i32_1 = arith.constant 0 : i32
    %c0_i32_2 = arith.constant 0 : i32
    return %c0_i32, %c0_i32_0, %c0_i32_1 : i32, i32, i32
  }
  func.func @transform_3(%arg0: i32) -> (i32, i32) {
    %c0_i32 = arith.constant 0 : i32
    %c0_i32_0 = arith.constant 0 : i32
    %c0_i32_1 = arith.constant 0 : i32
    return %c0_i32, %c0_i32_0 : i32, i32
  }
  func.func @transform_4(%arg0: i32) -> (i32, i32, i32) {
    %c0_i32 = arith.constant 0 : i32
    %c0_i32_0 = arith.constant 0 : i32
    %c0_i32_1 = arith.constant 0 : i32
    %c0_i32_2 = arith.constant 0 : i32
    return %c0_i32, %c0_i32_0, %c0_i32_1 : i32, i32, i32
  }
  func.func @transform_5(%arg0: i32) -> (i32, i32) {
    %c0_i32 = arith.constant 0 : i32
    %c0_i32_0 = arith.constant 0 : i32
    %c0_i32_1 = arith.constant 0 : i32
    return %c0_i32, %c0_i32_0 : i32, i32
  }
  func.func @transform_6(%arg0: i32) -> (i32, i32, i32) {
    %c0_i32 = arith.constant 0 : i32
    %c0_i32_0 = arith.constant 0 : i32
    %c0_i32_1 = arith.constant 0 : i32
    return %arg0, %c0_i32, %c0_i32_0 : i32, i32, i32
  }
}

</mosaic_0001>

<bundles_post_ra>
// kernel: tpu_custom_call.1
= control target key start
LH: loop header
LB: loop body
LE: loop exit
PB: predicated region body
PF: predicated region fallthrough
CT: control target
= control target key end

     0   :  { %11 = vsyncpa [#allocation4], 0  ;;  %s1769_s0 = inlined_call_operand.hbm [shape: f32[2,16,132], index: 0, kind: input, shape index: {}]   ;;  %s1770_s1 = inlined_call_operand.vmem [shape: f32[1,128], index: 1, kind: input, shape index: {}]   ;;  %s1771_s2 = inlined_call_operand.hbm [shape: f32[3,16,16], index: 2, kind: input, shape index: {}]   ;;  %s1772_s3 = inlined_call_operand.vmem [shape: f32[16,1], index: 3, kind: input, shape index: {}]   ;;  %s1773_s4 = inlined_call_operand.vmem [shape: f32[3,16,16], index: 4, kind: input, shape index: {}]   ;;  %s1774_s5 = inlined_call_operand.vmem [shape: f32[16,1], index: 5, kind: input, shape index: {}]   ;;  %s1775_s6 = inlined_call_operand.hbm [shape: f32[2,16,128], index: 6, kind: output, shape index: {}]  }
   0x1   :  { %13 = vsyncpa [#allocation4 + $0x1], 0 }
   0x2   :  { %14 = vsyncpa [#allocation7], 0 }
   0x3   :  { %15 = vsyncpa [#allocation5], 0 }
   0x4   :  { %17 = vsyncpa [#allocation5 + $0x1], 0  ;;  %s1478_s21 = smov 0   ;;  %s1480_s22 = smov 0  }
   0x5   :  { %s1482_s23 = smov 0   ;;  %s1484_s24 = smov 0  }
   0x6 LB: > { %s1499_s25 = sadd.s32 4294967295, %s1427_s24   ;;  %s1046_s26 = sadd.s32 4294967294, %s1427_s24   ;;  %s1427_s24 = sphi %s1484_s24, %s1795_s24   ;;  %s1423_s23 = sphi %s1482_s23, %s1794_s23   ;;  %s1419_s22 = sphi %s1480_s22, %s1793_s22   ;;  %s1415_s21 = sphi %s1478_s21, %s1792_s21  }
   0x7   : > { %p43_p0 = scmp.ne.s32.totalorder %s1419_s22, %s1415_s21  ;;  %p1776_p1 = scmp.eq.s32.totalorder %s1499_s25, 0 }
   0x8   : > { %p178_p3 = scmp.eq.s32.totalorder %s1046_s26, 1  ;;  %p1047_p5 = scmp.ge.s32.totalorder %s1427_s24, 1 }
   0x9   : > { %p1508_p4 = por %p1776_p1, %p43_p0  ;;  %p185_p7 = scmp.lt.s32.totalorder %s1427_s24, 3 }
   0xa   : > { %p1513_p6 = por %p178_p3, %p43_p0  ;;  %s1429_s30 = smov [#allocation6]  }
   0xb   : > { %s1779_s27 = scalar_select %p1508_p4, 1, 0 }
   0xc   : > { %s1780_s28 = scalar_select %p1513_p6, 1, 0 }
   0xd   : > { %p1518_p8 = pnand %p1047_p5, %p185_p7  ;;  %s200_s7 = sshll.u32 %s1429_s30, 4  ;;  %s1522_s7 = int_to_ptr.vmem [resolvable:$true] %s200_s7 }
   0xe   : > { %s1534_s9 = sadd.s32 1, %s1427_s24   ;;  %s30_s10 = sadd.s32 1, %s1423_s23 }
   0xf   : > { %s1781_s29 = scalar_select %p1518_p8, 1, 0 }
  0x10   : > { %p1189_p9 = pneg %p1518_p8  ;;  %s27_s11 = ssub.s32 %s1427_s24, %s1534_s9 }
  0x11   : > { %s1299_s14 = scalar_lea.hbm %s1771_s2, 768 }
  0x12   : > { %p1529_p11 = pnand %p1189_p9, %p1776_p1  ;;  %p1300_p12 = scmp.ne.s32.totalorder %s1771_s2, %s1299_s14 }
  0x13   : > { %p1306_p5 = scmp.lt.u32.totalorder %s1299_s14, %s1771_s2 }
  0x14   : > { %p1301_p13 = pneg %p1529_p11 }
  0x16   : > { %p1302_p0 = pnand %p1301_p13, %p1300_p12 }
  0x18   : > { %p1303_p3 = pneg %p1302_p0 }
  0x1a   : > { %p1308_p7 = pnand %p1306_p5, %p1303_p3 }
  0x1c   : > { %1311 = shalt.err (!%p1308_p7)
}
  0x1d   : > { %s1312_s19 = scalar_lea.vmem %s1522_s7, 768  ;;  %p1320_p2 = scmp.lt.s32.totalorder %s1522_s7, %s1522_s7 }
  0x1e   : > { %p1313_p9 = scmp.ne.s32.totalorder %s1522_s7, %s1312_s19  ;;  %p1321_p6 = scmp.lt.s32.totalorder %s1312_s19, %s1312_s19 }
  0x20   : > { %p1315_p10 = pnand %p1313_p9, %p1301_p13  ;;  %p1322_p4 = por %p1321_p6, %p1320_p2 }
  0x22   : > { %p1316_p1 = pneg %p1315_p10 }
  0x24   : > { %p1323_p8 = pnand %p1322_p4, %p1316_p1 }
  0x26   : > { %1326 = shalt.err (!%p1323_p8)
}
  0x27   : > { %s1430_s20 = smov 128   ;;  %s1431_s26 = smov 8  }
  0x28   : > { %1192 = dma.hbm_to_vmem [thread:$0]  (!%p1529_p11), %s1771_s2, 768, %s1522_s7, [#allocation7], %s1430_s20, %s1430_s20, %s1431_s26  }
  0x29   : > { %p28_p2 = scmp.eq.s32.totalorder %s27_s11, 0  ;;  %p37_p1 = scmp.ne.s32.totalorder %s1423_s23, %s1419_s22 }
  0x2a   : > { %p38_p4 = scmp.eq.s32.totalorder %s1427_s24, 0  ;;  %p1202_p6 = scmp.lt.s32.totalorder %s1427_s24, 2 }
  0x2b   : > { %s1565_s13 = scalar_select %p28_p2, %s1423_s23, %s30_s10  }
  0x2c   : > { %p39_p8 = por %p38_p4, %p37_p1  ;;  %p1783_p10 = scmp.eq.s32.totalorder %s1499_s25, 1 }
  0x2d   : > { %s223_s15 = sand.u32 1, %s1423_s23   ;;  %s1081_s16 = sshll.u32 %s1427_s24, 9 }
  0x2e   : > { %p1569_p12 = por %p1783_p10, %p37_p1  ;;  %s1050_s17 = sshll.u32 %s223_s15, 5 }
  0x2f   : > { %s1578_s19 = scalar_lea.hbm %s1769_s0, %s1081_s16  ;;  %s227_s7 = scalar_lea.vmem [#allocation3], %s1050_s17 }
  0x30   : > { %s234_s10 = sshll.u32 %s227_s7, 4  ;;  %p1580_p11 = pnand %p1202_p6, %p39_p8  ;;  %s1584_s10 = int_to_ptr.vmem [resolvable:$true] %s234_s10 }
  0x31   : > { %s1586_s20 = scalar_lea.sflag [#allocation4], %s223_s15  ;;  %s1327_s26 = scalar_lea.hbm %s1578_s19, 512 }
  0x32   : > { %p1328_p13 = scmp.ne.s32.totalorder %s1578_s19, %s1327_s26  ;;  %p1329_p0 = pneg %p1580_p11 }
  0x33   : > { %s1332_s16 = scalar_lea.hbm %s1769_s0, 1024  ;;  %p1333_p7 = scmp.lt.u32.totalorder %s1578_s19, %s1769_s0 }
  0x34   : > { %p1330_p3 = pnand %p1329_p0, %p1328_p13  ;;  %p1334_p9 = scmp.lt.u32.totalorder %s1332_s16, %s1327_s26 }
  0x35   : > { %p1336_p1 = scmp.lt.u32.totalorder %s1327_s26, %s1578_s19 }
  0x36   : > { %p1331_p5 = pneg %p1330_p3  ;;  %p1335_p2 = por %p1334_p9, %p1333_p7 }
  0x38   : > { %p1337_p4 = por %p1336_p1, %p1335_p2 }
  0x3a   : > { %p1338_p6 = pnand %p1337_p4, %p1331_p5 }
  0x3c   : > { %1341 = shalt.err (!%p1338_p6)
}
  0x3d   : > { %s1342_s15 = scalar_lea.vmem %s1584_s10, 512  ;;  %s1432_s18 = smov [#allocation3]  }
  0x3e   : > { %p1343_p8 = scmp.ne.s32.totalorder %s1584_s10, %s1342_s15  ;;  %s1347_s7 = sshll.u32 %s1432_s18, 4  ;;  %s1348_s7 = int_to_ptr.vmem [resolvable:$false] %s1347_s7 }
  0x3f   : > { %s1349_s30 = scalar_lea.vmem %s1348_s7, 1024  ;;  %p1350_p3 = scmp.lt.s32.totalorder %s1584_s10, %s1348_s7 }
  0x40   : > { %p1345_p10 = pnand %p1343_p8, %p1329_p0  ;;  %p1351_p7 = scmp.lt.s32.totalorder %s1349_s30, %s1342_s15 }
  0x42   : > { %p1346_p13 = pneg %p1345_p10  ;;  %p1352_p9 = por %p1351_p7, %p1350_p3 }
  0x44   : > { %p1353_p2 = pnand %p1352_p9, %p1346_p13 }
  0x46   : > { %1356 = shalt.err (!%p1353_p2)
}
  0x47   : > { %s1433_s26 = smov 256   ;;  %s1434_s12 = smov 16  }
  0x48   : > { %1196 = dma.hbm_to_vmem [thread:$0]  (!%p1580_p11), %s1578_s19, 512, %s1584_s10, %s1586_s20, %s1433_s26, %s1433_s26, %s1434_s12  }
  0x49   : > { %p1786_p0 = scmp.ne.s32.totalorder %s1781_s29, 0 }
  0x4a   : > { %s1617_s16 = sand.u32 (!%p1786_p0), 1, %s1419_s22   ;;  %p1787_p5 = scmp.ne.s32.totalorder (!%p1786_p0), %s1779_s27, 0 }
  0x4b   : > { %246 = sbr.rel (%p1786_p0) target bundleno = 1002 (0x3ea), region = 44  ;;  %s1054_s17 = sshll.u32 (!%p1786_p0), %s1617_s16, 5 }
  0x4c   : > { %s249_s8 = scalar_lea.sflag (!%p1786_p0), [#allocation4], %s1617_s16  ;;  %s252_s15 = scalar_lea.vmem (!%p1786_p0), [#allocation3], %s1054_s17 }
  0x52   : > { %1402 = dma.done.wait (%p1787_p5), %s249_s8, 512  }
  0x53   : > { %1404 = vsyncadd (%p1787_p5), %s249_s8, 4294966784  ;;  %p1788_p1 = scmp.eq.s32.totalorder %s1499_s25, 0 }
  0x55   : > { %1406 = dma.done.wait (%p1788_p1), [#allocation7], 768   ;;  %p1789_p11 = pmov %p1788_p1 }
  0x56   : > { %v1629_v0 = vld [vmem:[%s252_s15] sm:$0xff]  ;;  %v1631_v1 = vld [vmem:[%s252_s15 + $0x8] sm:$0xff]  ;;  %v1633_v2 = vld [vmem:[%s252_s15 + $0x10] sm:$0xff]  ;;  %vm312_vm0 = vcmask 130048   ;;  %s1435_s27 = smov 126   ;;  %s1436_s29 = smov 124  }
  0x57   : > { %1408 = vsyncadd (%p1789_p11), [#allocation7], 4294966528  ;;  %v1249_v3 = vpack.i.bf16 %v1631_v1, %v1629_v0  ;;  %v1637_v4 = vld [vmem:[%s252_s15 + $0x18] sm:$0xff]  ;;  %v293_v5 = vld [vmem:[#allocation6 + $0x10] sm:$0xff]  ;;  %v1437_v9 = vmov 0   ;;  %vm307_vm1 = vcmask 1031168   ;;  %v1153_v25 = vpack.c.bf16 %v1633_v2, %v1629_v0 }
  0x58   : > { %1111 = vmatprep.mubr.msk.f32.mxu0 %vm312_vm0, %v293_v5  ;;  %v1254_v6 = vpack.i.bf16 %v1637_v4, %v1633_v2  ;;  %v575_v7 = vld [vmem:[%s1772_s3 + $0x8] sm:$0xff]  ;;  %v574_v8 = vld [vmem:[%s1772_s3] sm:$0xff]  ;;  %1269 = vset.pattern.permute.xlu0 %v1437_v9  ;;  %vm486_vm2 = vcmask 1014784   ;;  %v294_v28 = vld [vmem:[#allocation6 + $0x18] sm:$0xff]  ;;  %vm603_vm3 = vcmask 31744   ;;  %v1438_v34 = vmov 0.0  }
  0x59   : > { %1250 = vrot.lane.b32.xlu0 %v1249_v3, %s1435_s27  ;;  %1260 = vrot.lane.b32.xlu1 %v1249_v3, %s1436_s29  ;;  %v288_v30 = vld [vmem:[#allocation6] sm:$0xff]  ;;  %v289_v31 = vld [vmem:[#allocation6 + $0x8] sm:$0xff]  ;;  %605 = vst.msk [vmem:[#allocation2 + $0x10] sm:$0xff] %vm603_vm3, %v1438_v34  ;;  %604 = vst.msk [vmem:[#allocation2] sm:$0xff] %vm603_vm3, %v1438_v34  ;;  %s1439_s30 = smov 4   ;;  %vm610_vm4 = vcmask 1047584  }
  0x5a   : > { %1270 = vset.pattern.permute.xlu1 %v1437_v9  ;;  %v476_v32 = vld [vmem:[#allocation6 + $0x20] sm:$0xff]  ;;  %v477_v33 = vld [vmem:[#allocation6 + $0x28] sm:$0xff]  ;;  %v1065_v55 = vld [vmem:[%s1773_s4 + $0x10] sm:$0xff]  ;;  %s1056_s17 = sshll.u32 %s1617_s16, 4  ;;  %s1082_s19 = sshll.u32 %s1499_s25, 8 }
  0x5b   : > { %v1063_v36 = vld [vmem:[%s1770_s1] ss:$0 sm:$0xff]  ;;  %1132 = vmatprep.mubr.msk.f32.mxu1 %vm312_vm0, %v1065_v55  ;;  %v905_v60 = vld [vmem:[%s1774_s5 + $0x8] sm:$0xff]  ;;  %s284_s8 = scalar_lea.vmem [#allocation8], %s1056_s17  ;;  %s1725_s10 = scalar_lea.hbm %s1775_s6, %s1082_s19 }
  0x5c   : > { %v904_v53 = vld [vmem:[%s1774_s5] sm:$0xff]  ;;  %s963_s15 = sshll.u32 %s284_s8, 4  ;;  %s950_s11 = scalar_lea.sflag [#allocation5], %s1617_s16  ;;  %s1719_s15 = int_to_ptr.vmem [resolvable:$true] %s963_s15 }
  0x5d   : > { %1255 = vrot.lane.b32.xlu0 %v1254_v6, %s1435_s27  ;;  %1265 = vrot.lane.b32.xlu1 %v1254_v6, %s1436_s29  ;;  %s1357_s20 = scalar_lea.vmem %s1719_s15, 256  ;;  %s1440_s25 = smov [#allocation8]  }
  0x5e   : > { %p1358_p4 = scmp.ne.s32.totalorder %s1719_s15, %s1357_s20  ;;  %s1361_s18 = sshll.u32 %s1440_s25, 4  ;;  %s1362_s18 = int_to_ptr.vmem [resolvable:$false] %s1361_s18 }
  0x5f   : > { %s1363_s7 = scalar_lea.vmem %s1362_s18, 512  ;;  %p1364_p10 = scmp.lt.s32.totalorder %s1719_s15, %s1362_s18 }
  0x60   : > { %p1359_p6 = pnand %p1358_p4, %p1569_p12  ;;  %p1365_p13 = scmp.lt.s32.totalorder %s1363_s7, %s1357_s20 }
  0x61   : > { %583 = vperm.xlu0 %1269, %v575_v7   ;;  %578 = vperm.xlu1 %1270, %v574_v8  }
  0x62   : > { %p1360_p8 = pneg %p1359_p6  ;;  %p1366_p3 = por %p1365_p13, %p1364_p10 }
  0x64   : > { %p1367_p7 = pnand %p1366_p3, %p1360_p8 }
  0xcb   : > { %v1251_v10 = vpop.permute.xlu0 %1250  ;;  %v1261_v11 = vpop.permute.xlu1 %1260 }
  0xcc   : > { %v1253_v12 = vunpack.i.h.bf16 %v1251_v10  ;;  %v1252_v13 = vunpack.i.l.bf16 %v1251_v10  ;;  %v1263_v15 = vunpack.i.h.bf16 %v1261_v11  ;;  %v1262_v16 = vunpack.i.l.bf16 %v1261_v11 }
  0xce   : > { %v308_v22 = vsel %vm307_vm1, %v1252_v13, %v1253_v12  ;;  %v487_v26 = vsel %vm486_vm2, %v1262_v16, %v1263_v15 }
  0xcf   : > { %v1256_v14 = vpop.permute.xlu0 %1255  ;;  %v1266_v17 = vpop.permute.xlu1 %1265 }
  0xd0   : > { %v1258_v18 = vunpack.i.h.bf16 %v1256_v14  ;;  %v1257_v19 = vunpack.i.l.bf16 %v1256_v14  ;;  %v1268_v20 = vunpack.i.h.bf16 %v1266_v17  ;;  %v1267_v21 = vunpack.i.l.bf16 %v1266_v17  ;;  %v621_v14 = vld [vmem:[%s1773_s4] sm:$0xff]  ;;  %v622_v17 = vld [vmem:[%s1773_s4 + $0x8] sm:$0xff] }
  0xd2   : > { %v309_v23 = vsel %vm307_vm1, %v1257_v19, %v1258_v18  ;;  %v488_v27 = vsel %vm486_vm2, %v1267_v21, %v1268_v20  ;;  %v1071_v18 = vld [vmem:[%s1773_s4 + $0x20] sm:$0xff]  ;;  %v1072_v19 = vld [vmem:[%s1773_s4 + $0x28] sm:$0xff] }
  0xd3   : > { %v1149_v24 = vpack.c.bf16 %v309_v23, %v308_v22  ;;  %v1157_v29 = vpack.c.bf16 %v488_v27, %v487_v26 }
  0xd5   : > { %1150 = vmatprep.subr.bf16.mxu0 %v1149_v24 }
  0xd6   : > { %1152 = vmatpush3.bf16.msra.mxu0 %v1149_v24 }
  0xd7   : > { %1154 = vmatprep.subr.bf16.mxu0 %v1153_v25 }
  0xd9   : > { %1112 = vmatmul.mubr.msk.f32.vlgmr.msra.gmra.mrb[0].mxu0 %vm312_vm0, %v294_v28 }
  0xda   : > { %1156 = vmatpush3.bf16.msra.mxu0 %v1153_v25  ;;  %1118 = vmatprep.mubr.msk.f32.mxu0 %vm312_vm0, %v288_v30 }
  0xdb   : > { %1158 = vmatprep.subr.bf16.mxu0 %v1157_v29 }
  0xe0   : > { %v584_v35 = vpop.permute.xlu0 %583  ;;  %v579_v44 = vpop.permute.xlu1 %578 }
  0xe1   : > { %1119 = vmatmul.mubr.msk.f32.vlgmr.msra.gmra.mrb[0].mxu0 %vm312_vm0, %v289_v31 }
  0xe2   : > { %1160 = vmatpush3.bf16.msra.mxu0 %v1157_v29  ;;  %1125 = vmatprep.mubr.msk.f32.mxu0 %vm312_vm0, %v476_v32 }
  0xe9   : > { %1126 = vmatmul.mubr.msk.f32.vlgmr.msra.gmra.mrb[0].mxu0 %vm312_vm0, %v477_v33 }
 0x1bc   : > { %v1127_v37 = vpop.f32.mrb[0].mxu0 }
 0x1bd   : > { %v587_v38 = vadd.f32 %v1127_v37, %v584_v35  ;;  %v563_v39 = vpop.f32.mrb[1].mxu0 }
 0x1be   : > { %v586_v45 = vadd.f32 %v579_v44, %v563_v39 }
 0x1bf   : > { %v595_v40 = vmul.f32 %v1063_v36, %v587_v38 }
 0x1c0   : > { %v594_v46 = vmul.f32 %v1063_v36, %v586_v45 }
 0x1c1   : > { %v1064_v41 = vmul.f32 -1.442695, %v595_v40  ;;  %614 = vrot.lane.b32.xlu0 %v595_v40, %s1439_s30 }
 0x1c3   : > { %1291 = vpow2.f32 %v1064_v41 }
 0x1cd   : > { %v1292_v42 = vpop.eup %1291 }
 0x1ce   : > { %v599_v43 = vadd.f32 1.0, %v1292_v42 }
 0x1d0   : > { %1293 = vrcp.f32 %v599_v43 }
 0x1da   : > { %v1294_v47 = vpop.eup %1293 }
 0x1db   : > { %v602_v48 = vmul.f32 %v1294_v47, %v594_v46 }
 0x1dd   : > { %607 = vrot.lane.b32.xlu1 %v602_v48, %s1439_s30 }
 0x233   : > { %v615_v49 = vpop.permute.xlu0 %614 }
 0x234   : > { %617 = vst.msk [vmem:[#allocation2 + $0x10] sm:$0xff] %vm610_vm4, %v615_v49 }
 0x235   : > { %618 = vst.msk [vmem:[#allocation2 + $0x18] sm:$0xff] %vm603_vm3, %v615_v49 }
 0x23b   : > { %v620_v50 = vld [vmem:[#allocation2 + $0x10] sm:$0xff] }
 0x23c   : > { %v624_v51 = vld [vmem:[#allocation2 + $0x18] sm:$0xff] }
 0x23d   : > { %v1276_v52 = vpack.i.bf16 %v624_v51, %v620_v50 }
 0x23f   : > { %1277 = vrot.lane.b32.xlu0 %v1276_v52, %s1435_s27 }
 0x243   : > { %1287 = vrot.lane.b32.xlu0 %v1276_v52, %s1436_s29 }
 0x247   : > { %908 = vperm.xlu0 %1269, %v904_v53  }
 0x24b   : > { %933 = vrot.lane.b32.xlu0 %v1631_v1, %s1436_s29 }
 0x24f   : > { %943 = vrot.lane.b32.xlu0 %v1637_v4, %s1436_s29  ;;  %v608_v54 = vpop.permute.xlu1 %607 }
 0x250   : > { %611 = vst.msk [vmem:[#allocation2] sm:$0xff] %vm610_vm4, %v608_v54 }
 0x251   : > { %612 = vst.msk [vmem:[#allocation2 + $0x8] sm:$0xff] %vm603_vm3, %v608_v54 }
 0x257   : > { %v619_v56 = vld [vmem:[#allocation2] sm:$0xff] }
 0x258   : > { %v623_v57 = vld [vmem:[#allocation2 + $0x8] sm:$0xff]  ;;  %v1165_v59 = vpack.c.bf16 %v620_v50, %v619_v56 }
 0x259   : > { %v1271_v58 = vpack.i.bf16 %v623_v57, %v619_v56 }
 0x25b   : > { %1272 = vrot.lane.b32.xlu1 %v1271_v58, %s1435_s27 }
 0x25f   : > { %1282 = vrot.lane.b32.xlu1 %v1271_v58, %s1436_s29 }
 0x263   : > { %913 = vperm.xlu1 %1270, %v905_v60  }
 0x267   : > { %931 = vrot.lane.b32.xlu1 %v1629_v0, %s1436_s29 }
 0x26b   : > { %941 = vrot.lane.b32.xlu1 %v1633_v2, %s1436_s29  ;;  %v1066_v2 = vld [vmem:[%s1773_s4 + $0x18] sm:$0xff] }
 0x2b1   : > { %v1278_v61 = vpop.permute.xlu0 %1277 }
 0x2b2   : > { %v1280_v62 = vunpack.i.h.bf16 %v1278_v61  ;;  %v1279_v63 = vunpack.i.l.bf16 %v1278_v61 }
 0x2b4   : > { %v641_v7 = vsel %vm307_vm1, %v1279_v63, %v1280_v62 }
 0x2b5   : > { %v1288_v5 = vpop.permute.xlu0 %1287 }
 0x2b6   : > { %v1290_v10 = vunpack.i.h.bf16 %v1288_v5  ;;  %v1289_v11 = vunpack.i.l.bf16 %v1288_v5 }
 0x2b8   : > { %v818_v15 = vsel %vm486_vm2, %v1289_v11, %v1290_v10 }
 0x2c6   : > { %v909_v20 = vpop.permute.xlu0 %908 }
 0x2ca   : > { %v934_v22 = vpop.permute.xlu0 %933 }
 0x2cd   : > { %v1273_v1 = vpop.permute.xlu1 %1272 }
 0x2ce   : > { %v1275_v3 = vunpack.i.h.bf16 %v1273_v1  ;;  %v1274_v4 = vunpack.i.l.bf16 %v1273_v1  ;;  %v944_v24 = vpop.permute.xlu0 %943 }
 0x2d0   : > { %v640_v6 = vsel %vm307_vm1, %v1274_v4, %v1275_v3 }
 0x2d1   : > { %v1283_v8 = vpop.permute.xlu1 %1282  ;;  %v1161_v9 = vpack.c.bf16 %v641_v7, %v640_v6 }
 0x2d2   : > { %v1285_v12 = vunpack.i.h.bf16 %v1283_v8  ;;  %v1284_v0 = vunpack.i.l.bf16 %v1283_v8 }
 0x2d3   : > { %1162 = vmatprep.subr.bf16.mxu1 %v1161_v9 }
 0x2d4   : > { %1164 = vmatpush3.bf16.msra.mxu1 %v1161_v9  ;;  %v817_v13 = vsel %vm486_vm2, %v1284_v0, %v1285_v12 }
 0x2d5   : > { %1166 = vmatprep.subr.bf16.mxu1 %v1165_v59  ;;  %v1169_v16 = vpack.c.bf16 %v818_v15, %v817_v13 }
 0x2d7   : > { %1133 = vmatmul.mubr.msk.f32.vlgmr.msra.gmra.mrb[0].mxu1 %vm312_vm0, %v1066_v2 }
 0x2d8   : > { %1168 = vmatpush3.bf16.msra.mxu1 %v1165_v59  ;;  %1139 = vmatprep.mubr.msk.f32.mxu1 %vm312_vm0, %v621_v14 }
 0x2d9   : > { %1170 = vmatprep.subr.bf16.mxu1 %v1169_v16 }
 0x2df   : > { %1140 = vmatmul.mubr.msk.f32.vlgmr.msra.gmra.mrb[0].mxu1 %vm312_vm0, %v622_v17 }
 0x2e0   : > { %1172 = vmatpush3.bf16.msra.mxu1 %v1169_v16  ;;  %1146 = vmatprep.mubr.msk.f32.mxu1 %vm312_vm0, %v1071_v18 }
 0x2e2   : > { %v914_v21 = vpop.permute.xlu1 %913 }
 0x2e6   : > { %v932_v23 = vpop.permute.xlu1 %931 }
 0x2e7   : > { %1147 = vmatmul.mubr.msk.f32.vlgmr.msra.gmra.mrb[0].mxu1 %vm312_vm0, %v1072_v19  ;;  %v935_v37 = vsel %vm486_vm2, %v932_v23, %v934_v22 }
 0x2ea   : > { %v942_v25 = vpop.permute.xlu1 %941 }
 0x2eb   : > { %v945_v27 = vsel %vm486_vm2, %v942_v25, %v944_v24 }
 0x3ba   : > { %v1148_v26 = vpop.f32.mrb[0].mxu1 }
 0x3bb   : > { %v917_v28 = vadd.f32 %v1148_v26, %v914_v21  ;;  %v893_v29 = vpop.f32.mrb[1].mxu1 }
 0x3bc   : > { %v916_v34 = vadd.f32 %v909_v20, %v893_v29 }
 0x3bd   : > { %v1075_v30 = vmul.f32 -1.442695, %v917_v28  ;;  %v947_v31 = vadd.f32 %v945_v27, %v917_v28 }
 0x3bf   : > { %1295 = vpow2.f32 %v1075_v30  ;;  %948 = vst [vmem:[%s284_s8 + $0x8] sm:$0xff] %v947_v31 }
 0x3c9   : > { %v1296_v32 = vpop.eup %1295 }
 0x3ca   : > { %v921_v33 = vadd.f32 1.0, %v1296_v32 }
 0x3cc   : > { %1297 = vrcp.f32 %v921_v33 }
 0x3d6   : > { %v1298_v35 = vpop.eup %1297 }
 0x3d7   : > { %v924_v36 = vmul.f32 %v1298_v35, %v916_v34 }
 0x3d9   : > { %v937_v38 = vadd.f32 %v935_v37, %v924_v36 }
 0x3db   : > { %938 = vst [vmem:[%s284_s8] sm:$0xff] %v937_v38 }
 0x3dc   : > { %1370 = shalt.err (!%p1367_p7)
}
 0x3dd   : > { %s1371_s30 = scalar_lea.hbm %s1725_s10, 256  ;;  %s1375_s17 = scalar_lea.hbm %s1775_s6, 512 }
 0x3de   : > { %p1372_p9 = scmp.ne.s32.totalorder %s1725_s10, %s1371_s30  ;;  %p1376_p5 = scmp.lt.u32.totalorder %s1725_s10, %s1775_s6 }
 0x3df   : > { %p1377_p1 = scmp.lt.u32.totalorder %s1375_s17, %s1371_s30  ;;  %p1379_p4 = scmp.lt.u32.totalorder %s1371_s30, %s1725_s10 }
 0x3e0   : > { %p1373_p2 = pnand %p1372_p9, %p1569_p12 }
 0x3e1   : > { %p1378_p11 = por %p1377_p1, %p1376_p5 }
 0x3e2   : > { %p1374_p0 = pneg %p1373_p2 }
 0x3e3   : > { %p1380_p6 = por %p1379_p4, %p1378_p11 }
 0x3e5   : > { %p1381_p8 = pnand %p1380_p6, %p1374_p0 }
 0x3e7   : > { %1384 = shalt.err (!%p1381_p8)
}
 0x3e8   : > { %s1441_s27 = smov 128   ;;  %s1442_s29 = smov 8  }
 0x3e9   : > { %1187 = dma.vmem_to_hbm [thread:$0]  (%p1569_p12), %s1719_s15, 256, %s1725_s10, %s950_s11, %s1441_s27, %s1441_s27, %s1442_s29  }
 0x3ea PF: > { %s978_s20 = sand.u32 1, %s1415_s21   ;;  %p1790_p10 = scmp.ne.s32.totalorder %s1780_s28, 0 }
 0x3eb   : > { %p1791_p13 = scmp.ge.s32.totalorder %s1427_s24, 2  ;;  %s979_s25 = scalar_lea.sflag [#allocation5], %s978_s20 }
 0x3ed   : > { %p1198_p3 = pnand %p1791_p13, %p1790_p10 }
 0x3ef   : > { %1410 = dma.done.wait (!%p1198_p3), %s979_s25, 256  }
 0x3f0   : > { %1412 = vsyncadd (!%p1198_p3), %s979_s25, 4294967040  ;;  %p20_p7 = scmp.ge.s32.totalorder %s1534_s9, 4   ;;  %s1792_s21 = smov %s1419_s22 }
 0x3f1   : > { %s1793_s22 = smov %s1423_s23  ;;  %s1794_s23 = smov %s1565_s13 }
 0x3f2   : > { %s1795_s24 = smov %s1534_s9  ;;  %22 = sbr.rel (!%p20_p7) target bundleno = 6 (0x6), region = 97 }
 0x3f9   :  { %984 = vsyncpa [#allocation4], 1 }
 0x3fa   :  { %986 = vsyncpa [#allocation4 + $0x1], 1 }
 0x3fb   :  { %987 = vsyncpa [#allocation7], 1 }
 0x3fc   :  { %988 = vsyncpa [#allocation5], 1 }
 0x3fd   :  { %990 = vsyncpa [#allocation5 + $0x1], 1 }

</bundles_post_ra>
